<compile_context>
chip_gen: v7x
topology: tpu7x:2x2x1
jax: 0.10.0
libtpu: 0.0.40
codegen_flags: <defaults>
</compile_context>

<pallas_src>
import math

import jax
import jax.numpy as jnp
from jax import lax
from jax.experimental import pallas as pl
from jax.experimental.pallas import tpu as pltpu


def mlp_disc_kernel(x_ref, w1_ref, b1_ref, w2_ref, b2_ref, w3_ref, b3_ref,
                    o_ref):
    x = x_ref[...]                          # (TILE_B, D), native dtype (f32/bf16)

    # Layer 1: Linear(D -> H) + ReLU   (MXU matmul, f32 accumulate)
    h1 = jnp.dot(x, w1_ref[...], preferred_element_type=jnp.float32)
    h1 = jnp.maximum(h1 + b1_ref[...], 0.0)             # f32 elementwise (VPU)

    # Layer 2: Linear(H -> H) + ReLU
    h2 = jnp.dot(h1, w2_ref[...], preferred_element_type=jnp.float32)
    h2 = jnp.maximum(h2 + b2_ref[...], 0.0)

    # Layer 3: Linear(H -> 1) + Sigmoid + clamp.  Contract the H axis of h2
    # against w3 (shape (1, H)) so the result comes out lane-dense as
    # (1, TILE_B) with no explicit XLU relayout of h2.
    z = lax.dot_general(w3_ref[...], h2,
                        dimension_numbers=(((1,), (1,)), ((), ())),
                        preferred_element_type=jnp.float32) + b3_ref[...]
    v = jnp.clip(jax.nn.sigmoid(z), 0.001, 0.999)        # (1, TILE_B) f32
    o_ref[0] = v.astype(o_ref.dtype)                     # unmasked lane-dense store


def _chip_config():
    """Generation-gated VMEM / pipelining knobs."""
    kind = ""
    try:
        kind = jax.devices()[0].device_kind.lower()
    except Exception:
        pass
    is_v7 = "v7" in kind
    try:
        vmem_cap = int(pltpu.get_tpu_info().vmem_capacity_bytes)
    except Exception:
        vmem_cap = (64 if is_v7 else 128) * 1024 * 1024
    # Budget for the streamed x buffers: ~40% of VMEM, capped at 48 MiB.
    # (v7x: ~25 MiB of its 64 MiB; v5e/v6e: 48 MiB of their 128 MiB.)
    x_budget = min(int(0.4 * vmem_cap), 48 * 1024 * 1024)
    return {"is_v7": is_v7, "vmem_cap": vmem_cap, "x_budget": x_budget,
            "num_bufs": 3 if is_v7 else 2}


def _pick_tile_b(batch, d, itemsize, cfg):
    """Bytes-targeted batch tile; never requires an HBM copy (pad) of x."""
    # ~8 MiB per x block amortizes the ~0.35 us/grid-step overhead and keeps
    # HBM-roofline DMA efficiency independent of D; bounded by the VMEM budget
    # divided by the pipeline depth.
    target_bytes = max(256 * 1024,
                       min(8 * 1024 * 1024, cfg["x_budget"] // cfg["num_bufs"]))
    row_bytes = max(d, 1) * itemsize
    max_rows = max(8, (target_bytes // row_bytes) // 8 * 8)

    if batch <= max_rows:
        tile = batch                                    # one block = full batch dim
        if cfg["is_v7"] and batch >= 16:
            # Ensure >= 2 grid steps so both v7x TensorCores get work.
            tile = min(batch, (((batch + 1) // 2) + 7) // 8 * 8)
        return tile

    # Prefer a multiple-of-8 tile that divides B exactly (no ragged tail) ...
    for t in range(max_rows, 7, -8):
        if batch % t == 0:
            return t
    # ... otherwise accept a ragged last block; its extra rows are garbage and
    # are discarded by the [:B] slice in the wrapper.
    return max_rows


def mlp_discriminator(x, params, *, tile_b=None, downcast_x_to_bf16=False):
    """x: (B, ...) flattened to (B, D).  Returns (B, 1) float32.

    downcast_x_to_bf16: opt-in bandwidth/precision tradeoff -- halves the
    dominant HBM read traffic; layer 1 then runs bf16 x bf16 on the MXU
    (f32 accumulate), so results differ from the f32 module by O(1e-2).
    """
    w1, b1, w2, b2, w3, b3 = params
    B = x.shape[0]
    x2d = x.reshape(B, -1)                  # no silent dtype up-cast of x
    if downcast_x_to_bf16:
        x2d = x2d.astype(jnp.bfloat16)
    D = x2d.shape[1]
    H = w2.shape[0]

    # Match layer-1 operand dtypes without touching x (weights are tiny).
    w1 = w1.astype(x2d.dtype)
    w3t = jnp.asarray(w3, jnp.float32).reshape(1, H)    # (1, H) for layer 3

    cfg = _chip_config()
    if tile_b is None:
        tile_b = _pick_tile_b(B, D, x2d.dtype.itemsize, cfg)
    tile_b = max(1, min(int(tile_b), B))
    num_tiles = -(-B // tile_b)             # ceil-div grid; NO jnp.pad of x

    itemsize = x2d.dtype.itemsize
    param_bytes = sum(int(p.size) * p.dtype.itemsize
                      for p in (w1, b1, w2, b2, w3t, b3))
    vmem_need = (cfg["num_bufs"] * tile_b * D * itemsize   # streamed x buffers
                 + 2 * param_bytes                         # resident weights
                 + 2 * tile_b * 4                          # output blocks
                 + (2 << 20))                              # scratch headroom
    vmem_limit = int(min(max(vmem_need, 16 << 20), int(0.75 * cfg["vmem_cap"])))

    cost = pl.CostEstimate(
        flops=int(2 * B * (D * H + H * H + H)),
        transcendentals=int(B),
        bytes_accessed=int(B * D * itemsize + B * 4 + param_bytes),
    )

    # x: batch-streamed.  On v7x, request a 3-deep pipeline to hide DMA issue
    # latency; fall back to default double buffering if this jax version
    # lacks pipeline_mode.
    x_spec = pl.BlockSpec((tile_b, D), lambda i: (i, 0))
    if cfg["is_v7"] and num_tiles >= 3:
        try:
            x_spec = pl.BlockSpec((tile_b, D), lambda i: (i, 0),
                                  pipeline_mode=pl.Buffered(3))
        except Exception:
            pass

    def full_spec(a):
        # Whole (tiny) array resident in VMEM; same block every grid step.
        return pl.BlockSpec(a.shape, lambda i: (0,) * a.ndim)

    out = pl.pallas_call(
        mlp_disc_kernel,
        out_shape=jax.ShapeDtypeStruct((num_tiles, 1, tile_b), jnp.float32),
        grid=(num_tiles,),
        in_specs=[
            x_spec,
            full_spec(w1), full_spec(b1),
            full_spec(w2), full_spec(b2),
            full_spec(w3t), full_spec(b3),
        ],
        out_specs=pl.BlockSpec((1, 1, tile_b), lambda i: (i, 0, 0)),
        compiler_params=pltpu.CompilerParams(
            dimension_semantics=("parallel",),   # megacore batch split on v7x
            vmem_limit_bytes=vmem_limit,
        ),
        cost_estimate=cost,
    )(x2d, w1, b1, w2, b2, w3t, b3)

    # Lane-dense (num_tiles, 1, TILE_B) -> (B, 1); drops any ragged-tail rows.
    return out.reshape(num_tiles * tile_b, 1)[:B]


def init_linear(key, in_f, out_f):
    """PyTorch nn.Linear default init: U(-1/sqrt(in_f), 1/sqrt(in_f)).
    Stored as (in_f, out_f) so the kernel computes x @ W."""
    kw, kb = jax.random.split(key)
    bound = 1.0 / math.sqrt(in_f)
    w = jax.random.uniform(kw, (in_f, out_f), jnp.float32, -bound, bound)
    b = jax.random.uniform(kb, (1, out_f), jnp.float32, -bound, bound)
    return w, b


def make_params(key, shape, hidden_units=16):
    k1, k2, k3 = jax.random.split(key, 3)
    w1, b1 = init_linear(k1, shape, hidden_units)
    w2, b2 = init_linear(k2, hidden_units, hidden_units)
    w3, b3 = init_linear(k3, hidden_units, 1)       # w3: (H, 1), b3: (1, 1)
    return (w1, b1, w2, b2, w3, b3)


def mlp_reference(x, params):
    """Pure-JAX reference matching the PyTorch forward."""
    w1, b1, w2, b2, w3, b3 = params
    x2d = x.reshape(x.shape[0], -1).astype(jnp.float32)
    h1 = jnp.maximum(x2d @ w1.astype(jnp.float32) + b1, 0.0)
    h2 = jnp.maximum(h1 @ w2 + b2, 0.0)
    return jnp.clip(jax.nn.sigmoid(h2 @ w3 + b3), 0.001, 0.999)


if __name__ == "__main__":
    key = jax.random.PRNGKey(0)
    k_x, k_x2, k_x3, k_p = jax.random.split(key, 4)

    # Small shapes: batch=2, channels=4, spatial=16x16 -> flattened D = 1024.
    B, C, Hs, Ws = 2, 4, 16, 16
    D = C * Hs * Ws
    hidden_units = 16

    params = make_params(k_p, D, hidden_units)

    # 1) f32 input (PyTorch module's default dtype); single full-batch block.
    x = jax.random.normal(k_x, (B, C, Hs, Ws), jnp.float32)
    out = mlp_discriminator(x, params)
    jax.block_until_ready(out)
    ref = mlp_reference(x, params)
    assert out.shape == (B, 1)
    assert bool(jnp.all(out >= 0.001)) and bool(jnp.all(out <= 0.999))
    assert bool(jnp.allclose(out, ref, atol=1e-2, rtol=1e-2))

    # 2) Opt-in bf16 downcast of x (half HBM traffic); looser tolerance since
    #    layer 1 runs bf16 x bf16 on the MXU.
    out_bf16 = mlp_discriminator(x, params, downcast_x_to_bf16=True)
    jax.block_until_ready(out_bf16)
    assert bool(jnp.allclose(out_bf16, ref, atol=5e-2, rtol=5e-2))

    # 3) Multi-tile batch grid (B divisible by tile_b: 3 grid steps, no pad).
    x_big = jax.random.normal(k_x2, (48, C, Hs, Ws), jnp.float32)
    out_big = mlp_discriminator(x_big, params, tile_b=16)
    jax.block_until_ready(out_big)
    ref_big = mlp_reference(x_big, params)
    assert out_big.shape == (48, 1)
    assert bool(jnp.allclose(out_big, ref_big, atol=1e-2, rtol=1e-2))

    # 4) Ragged tail (B % tile_b != 0): exercises the pad-free cdiv grid whose
    #    last block's extra rows are discarded by the [:B] slice.
    x_rag = jax.random.normal(k_x3, (50, C, Hs, Ws), jnp.float32)
    out_rag = mlp_discriminator(x_rag, params, tile_b=16)
    jax.block_until_ready(out_rag)
    ref_rag = mlp_reference(x_rag, params)
    assert out_rag.shape == (50, 1)
    assert bool(jnp.allclose(out_rag, ref_rag, atol=1e-2, rtol=1e-2))

    print("KERNEL_OK")
</pallas_src>

<mosaic_0001>
module attributes {stable_mosaic.version = 11 : i64} {
  func.func @mlp_disc_kernel(%arg0: i32, %arg1: memref<2x1024xf32, #tpu.memory_space<vmem>>, %arg2: memref<1024x16xf32, #tpu.memory_space<vmem>>, %arg3: memref<1x16xf32, #tpu.memory_space<vmem>>, %arg4: memref<16x16xf32, #tpu.memory_space<vmem>>, %arg5: memref<1x16xf32, #tpu.memory_space<vmem>>, %arg6: memref<1x16xf32, #tpu.memory_space<vmem>>, %arg7: memref<1x1xf32, #tpu.memory_space<vmem>>, %arg8: memref<1x1x2xf32, #tpu.memory_space<vmem>>) attributes {dimension_semantics = [#tpu.dimension_semantics<parallel>], iteration_bounds = array<i64: 1>, scalar_prefetch = 0 : i64, scratch_operands = 0 : i64, tpu.core_type = #tpu.core_type<tc>, window_params = [{transform_indices = @transform_0, window_bounds = array<i64: 2, 1024>}, {pipeline_mode = #tpu.pipeline_mode<synchronous>, transform_indices = @transform_1, window_bounds = array<i64: 1024, 16>}, {pipeline_mode = #tpu.pipeline_mode<synchronous>, transform_indices = @transform_2, window_bounds = array<i64: 1, 16>}, {pipeline_mode = #tpu.pipeline_mode<synchronous>, transform_indices = @transform_3, window_bounds = array<i64: 16, 16>}, {pipeline_mode = #tpu.pipeline_mode<synchronous>, transform_indices = @transform_4, window_bounds = array<i64: 1, 16>}, {pipeline_mode = #tpu.pipeline_mode<synchronous>, transform_indices = @transform_5, window_bounds = array<i64: 1, 16>}, {pipeline_mode = #tpu.pipeline_mode<synchronous>, transform_indices = @transform_6, window_bounds = array<i64: 1, 1>}, {transform_indices = @transform_7, window_bounds = array<i64: 1, 1, 2>}]} {
    %c0 = arith.constant 0 : index
    %c0_0 = arith.constant 0 : index
    %0 = vector.load %arg1[%c0, %c0_0] : memref<2x1024xf32, #tpu.memory_space<vmem>>, vector<2x1024xf32>
    %c0_1 = arith.constant 0 : index
    %c0_2 = arith.constant 0 : index
    %1 = vector.load %arg2[%c0_1, %c0_2] : memref<1024x16xf32, #tpu.memory_space<vmem>>, vector<1024x16xf32>
    %cst = arith.constant dense<0.000000e+00> : vector<2x16xf32>
    %2 = tpu.matmul %0, %1, %cst {dimension_numbers = #tpu.dot_dimension_numbers<[1], [0], [0], [1], [0, 0, 1, 1], [], []>} : vector<2x1024xf32>, vector<1024x16xf32>, vector<2x16xf32> -> vector<2x16xf32>
    %c0_3 = arith.constant 0 : index
    %c0_4 = arith.constant 0 : index
    %3 = vector.load %arg3[%c0_3, %c0_4] : memref<1x16xf32, #tpu.memory_space<vmem>>, vector<1x16xf32>
    %4 = vector.broadcast %3 : vector<1x16xf32> to vector<2x16xf32>
    %5 = arith.addf %2, %4 : vector<2x16xf32>
    %cst_5 = arith.constant 0.000000e+00 : f32
    %6 = vector.broadcast %cst_5 : f32 to vector<2x16xf32>
    %7 = arith.maximumf %5, %6 : vector<2x16xf32>
    %c0_6 = arith.constant 0 : index
    %c0_7 = arith.constant 0 : index
    %8 = vector.load %arg4[%c0_6, %c0_7] : memref<16x16xf32, #tpu.memory_space<vmem>>, vector<16x16xf32>
    %cst_8 = arith.constant dense<0.000000e+00> : vector<2x16xf32>
    %9 = tpu.matmul %7, %8, %cst_8 {dimension_numbers = #tpu.dot_dimension_numbers<[1], [0], [0], [1], [0, 0, 1, 1], [], []>} : vector<2x16xf32>, vector<16x16xf32>, vector<2x16xf32> -> vector<2x16xf32>
    %c0_9 = arith.constant 0 : index
    %c0_10 = arith.constant 0 : index
    %10 = vector.load %arg5[%c0_9, %c0_10] : memref<1x16xf32, #tpu.memory_space<vmem>>, vector<1x16xf32>
    %11 = vector.broadcast %10 : vector<1x16xf32> to vector<2x16xf32>
    %12 = arith.addf %9, %11 : vector<2x16xf32>
    %cst_11 = arith.constant 0.000000e+00 : f32
    %13 = vector.broadcast %cst_11 : f32 to vector<2x16xf32>
    %14 = arith.maximumf %12, %13 : vector<2x16xf32>
    %c0_12 = arith.constant 0 : index
    %c0_13 = arith.constant 0 : index
    %15 = vector.load %arg6[%c0_12, %c0_13] : memref<1x16xf32, #tpu.memory_space<vmem>>, vector<1x16xf32>
    %cst_14 = arith.constant dense<0.000000e+00> : vector<1x2xf32>
    %16 = tpu.matmul %15, %14, %cst_14 {dimension_numbers = #tpu.dot_dimension_numbers<[1], [1], [0], [0], [0, 0, 1, 0], [], []>} : vector<1x16xf32>, vector<2x16xf32>, vector<1x2xf32> -> vector<1x2xf32>
    %c0_15 = arith.constant 0 : index
    %c0_16 = arith.constant 0 : index
    %17 = vector.load %arg7[%c0_15, %c0_16] : memref<1x1xf32, #tpu.memory_space<vmem>>, vector<1x1xf32>
    %18 = vector.broadcast %17 : vector<1x1xf32> to vector<1x2xf32>
    %19 = arith.addf %16, %18 : vector<1x2xf32>
    %20 = arith.negf %19 : vector<1x2xf32>
    %21 = math.exp %20 : vector<1x2xf32>
    %cst_17 = arith.constant 1.000000e+00 : f32
    %22 = vector.broadcast %cst_17 : f32 to vector<1x2xf32>
    %23 = arith.addf %22, %21 : vector<1x2xf32>
    %24 = arith.divf %22, %23 : vector<1x2xf32>
    %cst_18 = arith.constant 1.000000e-03 : f32
    %cst_19 = arith.constant 9.990000e-01 : f32
    %25 = vector.broadcast %cst_18 : f32 to vector<1x2xf32>
    %26 = arith.maximumf %25, %24 : vector<1x2xf32>
    %27 = vector.broadcast %cst_19 : f32 to vector<1x2xf32>
    %28 = arith.minimumf %27, %26 : vector<1x2xf32>
    %c0_20 = arith.constant 0 : index
    %c0_21 = arith.constant 0 : index
    %c0_22 = arith.constant 0 : index
    %29 = vector.load %arg8[%c0_20, %c0_21, %c0_22] : memref<1x1x2xf32, #tpu.memory_space<vmem>>, vector<1x1x2xf32>
    %30 = vector.shape_cast %29 : vector<1x1x2xf32> to vector<1x2xf32>
    %31 = vector.shape_cast %28 : vector<1x2xf32> to vector<1x1x2xf32>
    tpu.vector_store %arg8[%c0_20, %c0_21, %c0_22], %31 {strides = array<i32>} : memref<1x1x2xf32, #tpu.memory_space<vmem>>, vector<1x1x2xf32>,
    return
  }
  func.func @transform_0(%arg0: i32) -> (i32, i32) {
    %c0_i32 = arith.constant 0 : i32
    %c0_i32_0 = arith.constant 0 : i32
    return %arg0, %c0_i32 : i32, i32
  }
  func.func @transform_1(%arg0: i32) -> (i32, i32) {
    %c0_i32 = arith.constant 0 : i32
    %c0_i32_0 = arith.constant 0 : i32
    %c0_i32_1 = arith.constant 0 : i32
    return %c0_i32, %c0_i32_0 : i32, i32
  }
  func.func @transform_2(%arg0: i32) -> (i32, i32) {
    %c0_i32 = arith.constant 0 : i32
    %c0_i32_0 = arith.constant 0 : i32
    %c0_i32_1 = arith.constant 0 : i32
    return %c0_i32, %c0_i32_0 : i32, i32
  }
  func.func @transform_3(%arg0: i32) -> (i32, i32) {
    %c0_i32 = arith.constant 0 : i32
    %c0_i32_0 = arith.constant 0 : i32
    %c0_i32_1 = arith.constant 0 : i32
    return %c0_i32, %c0_i32_0 : i32, i32
  }
  func.func @transform_4(%arg0: i32) -> (i32, i32) {
    %c0_i32 = arith.constant 0 : i32
    %c0_i32_0 = arith.constant 0 : i32
    %c0_i32_1 = arith.constant 0 : i32
    return %c0_i32, %c0_i32_0 : i32, i32
  }
  func.func @transform_5(%arg0: i32) -> (i32, i32) {
    %c0_i32 = arith.constant 0 : i32
    %c0_i32_0 = arith.constant 0 : i32
    %c0_i32_1 = arith.constant 0 : i32
    return %c0_i32, %c0_i32_0 : i32, i32
  }
  func.func @transform_6(%arg0: i32) -> (i32, i32) {
    %c0_i32 = arith.constant 0 : i32
    %c0_i32_0 = arith.constant 0 : i32
    %c0_i32_1 = arith.constant 0 : i32
    return %c0_i32, %c0_i32_0 : i32, i32
  }
  func.func @transform_7(%arg0: i32) -> (i32, i32, i32) {
    %c0_i32 = arith.constant 0 : i32
    %c0_i32_0 = arith.constant 0 : i32
    %c0_i32_1 = arith.constant 0 : i32
    return %arg0, %c0_i32, %c0_i32_0 : i32, i32, i32
  }
}

</mosaic_0001>

<bundles_post_ra>
// kernel: tpu_custom_call.1
= control target key start
LH: loop header
LB: loop body
LE: loop exit
PB: predicated region body
PF: predicated region fallthrough
CT: control target
= control target key end

     0   :  { %s1498_s0 = inlined_call_operand.vmem [shape: f32[2,1024], index: 0, kind: input, shape index: {}]   ;;  %s1499_s1 = inlined_call_operand.vmem [shape: f32[1024,16], index: 1, kind: input, shape index: {}]   ;;  %s1500_s2 = inlined_call_operand.vmem [shape: f32[1,16], index: 2, kind: input, shape index: {}]   ;;  %s1501_s3 = inlined_call_operand.vmem [shape: f32[16,16], index: 3, kind: input, shape index: {}]   ;;  %s1502_s4 = inlined_call_operand.vmem [shape: f32[1,16], index: 4, kind: input, shape index: {}]   ;;  %s1503_s5 = inlined_call_operand.vmem [shape: f32[1,16], index: 5, kind: input, shape index: {}]   ;;  %s1504_s6 = inlined_call_operand.<no memory space> [shape: f32[1,1], index: 6, kind: input, shape index: {}]   ;;  %s1505_s7 = inlined_call_operand.hbm [shape: f32[1,1,2], index: 7, kind: output, shape index: {}]  }
   0x1   :  { %v12_v0 = vstv %s1504_s6 }
   0x2   :  { %13 = vst [vmem:[#allocation2] sm:$0x1] %v12_v0 }
   0x3   :  { %v47_v1 = vld [vmem:[%s1499_s1 + $0x80] sm:$0xff]  ;;  %v48_v2 = vld [vmem:[%s1499_s1 + $0x88] sm:$0xff]  ;;  %v49_v12 = vld [vmem:[%s1499_s1 + $0x90] sm:$0xff]  ;;  %v1017_v48 = vmov 1983009808   ;;  %v172_v50 = vlaneseq }
   0x4   :  { %v31_v3 = vld [vmem:[%s1499_s1] sm:$0xff]  ;;  %v849_v4 = vpack.c.bf16 %v48_v2, %v47_v1  ;;  %v32_v5 = vld [vmem:[%s1499_s1 + $0x8] sm:$0xff]  ;;  %v50_v14 = vld [vmem:[%s1499_s1 + $0x98] sm:$0xff]  ;;  %v170_v49 = vunpack.c.l.s4 %v1017_v48 }
   0x5   :  { %v79_v6 = vld [vmem:[%s1499_s1 + $0x180] sm:$0xff]  ;;  %v80_v7 = vld [vmem:[%s1499_s1 + $0x188] sm:$0xff]  ;;  %v851_v8 = vpack.c.bf16 %v32_v5, %v31_v3  ;;  %v33_v15 = vld [vmem:[%s1499_s1 + $0x10] sm:$0xff]  ;;  %v853_v17 = vpack.c.bf16 %v50_v14, %v49_v12  ;;  %v1192_v1 = vshrl.u32 %v172_v50, 7 }
   0x6   :  { %v881_v9 = vpack.c.bf16 %v80_v7, %v79_v6  ;;  %v63_v10 = vld [vmem:[%s1499_s1 + $0x100] sm:$0xff]  ;;  %v64_v11 = vld [vmem:[%s1499_s1 + $0x108] sm:$0xff]  ;;  %850 = vmatprep.subr.bf16.mxu0 %v849_v4  ;;  %v34_v16 = vld [vmem:[%s1499_s1 + $0x18] sm:$0xff]  ;;  %v171_v0 = vunpack.c.0.s8 %v170_v49 }
   0x7   :  { %v883_v13 = vpack.c.bf16 %v64_v11, %v63_v10  ;;  %852 = vmatpush3.bf16.msra.mxu0 %v851_v8  ;;  %v855_v18 = vpack.c.bf16 %v34_v16, %v33_v15  ;;  %v81_v19 = vld [vmem:[%s1499_s1 + $0x190] sm:$0xff]  ;;  %v82_v20 = vld [vmem:[%s1499_s1 + $0x198] sm:$0xff]  ;;  %v51_v24 = vld [vmem:[%s1499_s1 + $0xa0] sm:$0xff] }
   0x8   :  { %882 = vmatprep.subr.bf16.mxu1 %v881_v9  ;;  %v65_v21 = vld [vmem:[%s1499_s1 + $0x110] sm:$0xff]  ;;  %v885_v22 = vpack.c.bf16 %v82_v20, %v81_v19  ;;  %v66_v23 = vld [vmem:[%s1499_s1 + $0x118] sm:$0xff]  ;;  %v52_v25 = vld [vmem:[%s1499_s1 + $0xa8] sm:$0xff]  ;;  %854 = vmatprep.subr.bf16.mxu0 %v853_v17  ;;  %v1219_v14 = vsub.s32 %v171_v0, %v1192_v1 }
   0x9   :  { %884 = vmatpush3.bf16.msra.mxu1 %v883_v13  ;;  %v887_v26 = vpack.c.bf16 %v66_v23, %v65_v21  ;;  %v857_v27 = vpack.c.bf16 %v52_v25, %v51_v24  ;;  %v35_v28 = vld [vmem:[%s1499_s1 + $0x20] sm:$0xff]  ;;  %v36_v29 = vld [vmem:[%s1499_s1 + $0x28] sm:$0xff]  ;;  %v53_v36 = vld [vmem:[%s1499_s1 + $0xb0] sm:$0xff] }
   0xa   :  { %v83_v30 = vld [vmem:[%s1499_s1 + $0x1a0] sm:$0xff]  ;;  %886 = vmatprep.subr.bf16.mxu1 %v885_v22  ;;  %v84_v31 = vld [vmem:[%s1499_s1 + $0x1a8] sm:$0xff]  ;;  %v859_v34 = vpack.c.bf16 %v36_v29, %v35_v28  ;;  %v54_v37 = vld [vmem:[%s1499_s1 + $0xb8] sm:$0xff] }
   0xb   :  { %v67_v32 = vld [vmem:[%s1499_s1 + $0x120] sm:$0xff]  ;;  %v68_v33 = vld [vmem:[%s1499_s1 + $0x128] sm:$0xff]  ;;  %856 = vmatpush3.bf16.msra.mxu0 %v855_v18  ;;  %v889_v35 = vpack.c.bf16 %v84_v31, %v83_v30  ;;  %v37_v38 = vld [vmem:[%s1499_s1 + $0x30] sm:$0xff]  ;;  %v861_v40 = vpack.c.bf16 %v54_v37, %v53_v36 }
   0xc   :  { %858 = vmatprep.subr.bf16.mxu0 %v857_v27  ;;  %v891_v39 = vpack.c.bf16 %v68_v33, %v67_v32  ;;  %v38_v41 = vld [vmem:[%s1499_s1 + $0x38] sm:$0xff]  ;;  %v85_v42 = vld [vmem:[%s1499_s1 + $0x1b0] sm:$0xff]  ;;  %v55_v47 = vld [vmem:[%s1499_s1 + $0xc0] sm:$0xff] }
   0xd   :  { %888 = vmatpush3.bf16.msra.mxu1 %v887_v26  ;;  %v86_v43 = vld [vmem:[%s1499_s1 + $0x1b8] sm:$0xff]  ;;  %v69_v45 = vld [vmem:[%s1499_s1 + $0x130] sm:$0xff]  ;;  %v56_v51 = vld [vmem:[%s1499_s1 + $0xc8] sm:$0xff]  ;;  %v863_v52 = vpack.c.bf16 %v38_v41, %v37_v38 }
   0xe   :  { %890 = vmatprep.subr.bf16.mxu1 %v889_v35  ;;  %v893_v44 = vpack.c.bf16 %v86_v43, %v85_v42  ;;  %v70_v46 = vld [vmem:[%s1499_s1 + $0x138] sm:$0xff]  ;;  %v87_v53 = vld [vmem:[%s1499_s1 + $0x1c0] sm:$0xff]  ;;  %v88_v54 = vld [vmem:[%s1499_s1 + $0x1c8] sm:$0xff]  ;;  %v865_v56 = vpack.c.bf16 %v56_v51, %v55_v47 }
   0xf   :  { %860 = vmatpush3.bf16.msra.mxu0 %v859_v34  ;;  %v895_v55 = vpack.c.bf16 %v70_v46, %v69_v45  ;;  %v39_v57 = vld [vmem:[%s1499_s1 + $0x40] sm:$0xff]  ;;  %v40_v58 = vld [vmem:[%s1499_s1 + $0x48] sm:$0xff]  ;;  %v897_v60 = vpack.c.bf16 %v88_v54, %v87_v53  ;;  %v57_v62 = vld [vmem:[%s1499_s1 + $0xd0] sm:$0xff] }
  0x10   :  { %862 = vmatprep.subr.bf16.mxu0 %v861_v40  ;;  %v71_v59 = vld [vmem:[%s1499_s1 + $0x140] sm:$0xff]  ;;  %v72_v61 = vld [vmem:[%s1499_s1 + $0x148] sm:$0xff]  ;;  %v58_v63 = vld [vmem:[%s1499_s1 + $0xd8] sm:$0xff]  ;;  %v867_v4 = vpack.c.bf16 %v40_v58, %v39_v57 }
  0x11   :  { %892 = vmatpush3.bf16.msra.mxu1 %v891_v39  ;;  %v89_v2 = vld [vmem:[%s1499_s1 + $0x1d0] sm:$0xff]  ;;  %v90_v3 = vld [vmem:[%s1499_s1 + $0x1d8] sm:$0xff]  ;;  %v899_v5 = vpack.c.bf16 %v72_v61, %v71_v59  ;;  %v869_v6 = vpack.c.bf16 %v58_v63, %v57_v62  ;;  %v59_v12 = vld [vmem:[%s1499_s1 + $0xe0] sm:$0xff] }
  0x12   :  { %894 = vmatprep.subr.bf16.mxu1 %v893_v44  ;;  %v41_v7 = vld [vmem:[%s1499_s1 + $0x50] sm:$0xff]  ;;  %v42_v8 = vld [vmem:[%s1499_s1 + $0x58] sm:$0xff]  ;;  %v901_v10 = vpack.c.bf16 %v90_v3, %v89_v2  ;;  %v60_v13 = vld [vmem:[%s1499_s1 + $0xe8] sm:$0xff] }
  0x13   :  { %864 = vmatpush3.bf16.msra.mxu0 %v863_v52  ;;  %v73_v9 = vld [vmem:[%s1499_s1 + $0x150] sm:$0xff]  ;;  %v74_v11 = vld [vmem:[%s1499_s1 + $0x158] sm:$0xff]  ;;  %v91_v15 = vld [vmem:[%s1499_s1 + $0x1e0] sm:$0xff]  ;;  %v871_v17 = vpack.c.bf16 %v42_v8, %v41_v7  ;;  %v873_v20 = vpack.c.bf16 %v60_v13, %v59_v12 }
  0x14   :  { %866 = vmatprep.subr.bf16.mxu0 %v865_v56  ;;  %v92_v16 = vld [vmem:[%s1499_s1 + $0x1e8] sm:$0xff]  ;;  %v43_v18 = vld [vmem:[%s1499_s1 + $0x60] sm:$0xff]  ;;  %v903_v19 = vpack.c.bf16 %v74_v11, %v73_v9  ;;  %v61_v26 = vld [vmem:[%s1499_s1 + $0xf0] sm:$0xff] }
  0x15   :  { %896 = vmatpush3.bf16.msra.mxu1 %v895_v55  ;;  %v44_v21 = vld [vmem:[%s1499_s1 + $0x68] sm:$0xff]  ;;  %v75_v22 = vld [vmem:[%s1499_s1 + $0x160] sm:$0xff]  ;;  %v905_v24 = vpack.c.bf16 %v92_v16, %v91_v15  ;;  %v62_v27 = vld [vmem:[%s1499_s1 + $0xf8] sm:$0xff] }
  0x16   :  { %898 = vmatprep.subr.bf16.mxu1 %v897_v60  ;;  %v29_v23 = vld [vmem:[%s1498_s0] sm:$0xff]  ;;  %v76_v25 = vld [vmem:[%s1499_s1 + $0x168] sm:$0xff]  ;;  %v93_v30 = vld [vmem:[%s1499_s1 + $0x1f0] sm:$0xff]  ;;  %v875_v32 = vpack.c.bf16 %v44_v21, %v43_v18  ;;  %v877_v36 = vpack.c.bf16 %v62_v27, %v61_v26 }
  0x17   :  { %868 = vmatpush3.bf16.msra.mxu0 %v867_v4  ;;  %v175_v28 = vrot.slane %v29_v23, %v1219_v14  ;;  %v168_v29 = vcombine.high %v29_v23, %v29_v23  ;;  %v94_v31 = vld [vmem:[%s1499_s1 + $0x1f8] sm:$0xff]  ;;  %v907_v35 = vpack.c.bf16 %v76_v25, %v75_v22  ;;  %v45_v37 = vld [vmem:[%s1499_s1 + $0x70] sm:$0xff]  ;;  %v111_v42 = vld [vmem:[%s1499_s1 + $0x280] sm:$0xff] }
  0x18   :  { %870 = vmatprep.subr.bf16.mxu0 %v869_v6  ;;  %v46_v38 = vld [vmem:[%s1499_s1 + $0x78] sm:$0xff]  ;;  %v77_v39 = vld [vmem:[%s1499_s1 + $0x170] sm:$0xff]  ;;  %v909_v40 = vpack.c.bf16 %v94_v31, %v93_v30  ;;  %v112_v43 = vld [vmem:[%s1499_s1 + $0x288] sm:$0xff] }
  0x19   :  { %900 = vmatpush3.bf16.msra.mxu1 %v899_v5  ;;  %v183_v33 = vcombine.high %v175_v28, %v175_v28  ;;  %v182_v34 = vrot.slane %v168_v29, %v1219_v14  ;;  %v78_v41 = vld [vmem:[%s1499_s1 + $0x178] sm:$0xff]  ;;  %v143_v45 = vld [vmem:[%s1499_s1 + $0x380] sm:$0xff]  ;;  %v144_v46 = vld [vmem:[%s1499_s1 + $0x388] sm:$0xff]  ;;  %v879_v47 = vpack.c.bf16 %v46_v38, %v45_v37  ;;  %v913_v49 = vpack.c.bf16 %v112_v43, %v111_v42 }
  0x1a   :  { %902 = vmatprep.subr.bf16.mxu1 %v901_v10  ;;  %v911_v48 = vpack.c.bf16 %v78_v41, %v77_v39  ;;  %v95_v50 = vld [vmem:[%s1499_s1 + $0x200] sm:$0xff]  ;;  %v96_v51 = vld [vmem:[%s1499_s1 + $0x208] sm:$0xff]  ;;  %v945_v53 = vpack.c.bf16 %v144_v46, %v143_v45  ;;  %v113_v55 = vld [vmem:[%s1499_s1 + $0x290] sm:$0xff] }
  0x1b   :  { %872 = vmatpush3.bf16.msra.mxu0 %v871_v17  ;;  %274 = vmatprep.mubr.f32.mxu0 %v183_v33  ;;  %v184_v44 = vcombine.high %v182_v34, %v182_v34  ;;  %v127_v52 = vld [vmem:[%s1499_s1 + $0x300] sm:$0xff]  ;;  %v128_v54 = vld [vmem:[%s1499_s1 + $0x308] sm:$0xff]  ;;  %v114_v56 = vld [vmem:[%s1499_s1 + $0x298] sm:$0xff]  ;;  %v915_v59 = vpack.c.bf16 %v96_v51, %v95_v50 }
  0x1c   :  { %874 = vmatprep.subr.bf16.mxu0 %v873_v20  ;;  %v145_v57 = vld [vmem:[%s1499_s1 + $0x390] sm:$0xff]  ;;  %v146_v58 = vld [vmem:[%s1499_s1 + $0x398] sm:$0xff]  ;;  %v947_v60 = vpack.c.bf16 %v128_v54, %v127_v52  ;;  %v917_v61 = vpack.c.bf16 %v114_v56, %v113_v55  ;;  %v115_v4 = vld [vmem:[%s1499_s1 + $0x2a0] sm:$0xff] }
  0x1d   :  { %904 = vmatpush3.bf16.msra.mxu1 %v903_v19  ;;  %344 = vmatprep.mubr.f32.mxu1 %v184_v44  ;;  %v97_v62 = vld [vmem:[%s1499_s1 + $0x210] sm:$0xff]  ;;  %v98_v63 = vld [vmem:[%s1499_s1 + $0x218] sm:$0xff]  ;;  %v949_v2 = vpack.c.bf16 %v146_v58, %v145_v57  ;;  %v116_v5 = vld [vmem:[%s1499_s1 + $0x2a8] sm:$0xff] }
  0x1e   :  { %906 = vmatprep.subr.bf16.mxu1 %v905_v24  ;;  %v129_v0 = vld [vmem:[%s1499_s1 + $0x310] sm:$0xff]  ;;  %v130_v3 = vld [vmem:[%s1499_s1 + $0x318] sm:$0xff]  ;;  %v147_v6 = vld [vmem:[%s1499_s1 + $0x3a0] sm:$0xff]  ;;  %v919_v8 = vpack.c.bf16 %v98_v63, %v97_v62  ;;  %v921_v10 = vpack.c.bf16 %v116_v5, %v115_v4 }
  0x1f   :  { %876 = vmatpush3.bf16.msra.mxu0 %v875_v32  ;;  %v148_v7 = vld [vmem:[%s1499_s1 + $0x3a8] sm:$0xff]  ;;  %v951_v9 = vpack.c.bf16 %v130_v3, %v129_v0  ;;  %v99_v11 = vld [vmem:[%s1499_s1 + $0x220] sm:$0xff]  ;;  %v117_v17 = vld [vmem:[%s1499_s1 + $0x2b0] sm:$0xff] }
  0x20   :  { %878 = vmatprep.subr.bf16.mxu0 %v877_v36  ;;  %v100_v12 = vld [vmem:[%s1499_s1 + $0x228] sm:$0xff]  ;;  %v131_v13 = vld [vmem:[%s1499_s1 + $0x320] sm:$0xff]  ;;  %v953_v15 = vpack.c.bf16 %v148_v7, %v147_v6  ;;  %v118_v18 = vld [vmem:[%s1499_s1 + $0x2b8] sm:$0xff] }
  0x21   :  { %908 = vmatpush3.bf16.msra.mxu1 %v907_v35  ;;  %v132_v16 = vld [vmem:[%s1499_s1 + $0x328] sm:$0xff]  ;;  %v149_v19 = vld [vmem:[%s1499_s1 + $0x3b0] sm:$0xff]  ;;  %v150_v20 = vld [vmem:[%s1499_s1 + $0x3b8] sm:$0xff]  ;;  %v923_v21 = vpack.c.bf16 %v100_v12, %v99_v11  ;;  %v925_v24 = vpack.c.bf16 %v118_v18, %v117_v17 }
  0x22   :  { %910 = vmatprep.subr.bf16.mxu1 %v909_v40  ;;  %v101_v22 = vld [vmem:[%s1499_s1 + $0x230] sm:$0xff]  ;;  %v955_v23 = vpack.c.bf16 %v132_v16, %v131_v13  ;;  %v102_v25 = vld [vmem:[%s1499_s1 + $0x238] sm:$0xff]  ;;  %v119_v29 = vld [vmem:[%s1499_s1 + $0x2c0] sm:$0xff] }
  0x23   :  { %880 = vmatpush3.bf16.msra.mxu0 %v879_v47  ;;  %v133_v26 = vld [vmem:[%s1499_s1 + $0x330] sm:$0xff]  ;;  %v134_v27 = vld [vmem:[%s1499_s1 + $0x338] sm:$0xff]  ;;  %v120_v30 = vld [vmem:[%s1499_s1 + $0x2c8] sm:$0xff] }
  0x24   :  { %914 = vmatprep.subr.bf16.mxu0 %v913_v49  ;;  %v151_v31 = vld [vmem:[%s1499_s1 + $0x3c0] sm:$0xff]  ;;  %v152_v32 = vld [vmem:[%s1499_s1 + $0x3c8] sm:$0xff] }
  0x25   :  { %912 = vmatpush3.bf16.msra.mxu1 %v911_v48  ;;  %v30_v33 = vld [vmem:[%s1498_s0 + $0x8] sm:$0xff] }
  0x26   :  { %946 = vmatprep.subr.bf16.mxu1 %v945_v53  ;;  %275 = vmatmul.mubr.f32.vlgmr.msra.gmra.mrb[0].mxu0 %v175_v28  ;;  %v957_v28 = vpack.c.bf16 %v150_v20, %v149_v19 }
  0x27   :  { %916 = vmatpush3.bf16.msra.mxu0 %v915_v59 }
  0x28   :  { %345 = vmatmul.mubr.f32.vlgmr.msra.gmra.mrb[0].mxu1 %v182_v34  ;;  %918 = vmatprep.subr.bf16.mxu0 %v917_v61 }
  0x29   :  { %948 = vmatpush3.bf16.msra.mxu1 %v947_v60 }
  0x2a   :  { %950 = vmatprep.subr.bf16.mxu1 %v949_v2 }
  0x2b   :  { %920 = vmatpush3.bf16.msra.mxu0 %v919_v8 }
  0x2c   :  { %922 = vmatprep.subr.bf16.mxu0 %v921_v10 }
  0x2d   :  { %952 = vmatpush3.bf16.msra.mxu1 %v951_v9 }
  0x2e   :  { %954 = vmatprep.subr.bf16.mxu1 %v953_v15 }
  0x2f   :  { %14 = vsyncpa [#allocation4], 0  ;;  %924 = vmatpush3.bf16.msra.mxu0 %v923_v21  ;;  %v927_v34 = vpack.c.bf16 %v102_v25, %v101_v22  ;;  %v1380_v35 = vrot.slane %v30_v33, %v1219_v14  ;;  %v185_v36 = vcombine.high %v30_v33, %v30_v33  ;;  %v959_v37 = vpack.c.bf16 %v134_v27, %v133_v26  ;;  %v103_v39 = vld [vmem:[%s1499_s1 + $0x240] sm:$0xff]  ;;  %v104_v40 = vld [vmem:[%s1499_s1 + $0x248] sm:$0xff] }
  0x30   :  { %926 = vmatprep.subr.bf16.mxu0 %v925_v24  ;;  %v929_v38 = vpack.c.bf16 %v120_v30, %v119_v29  ;;  %v135_v41 = vld [vmem:[%s1499_s1 + $0x340] sm:$0xff]  ;;  %v961_v42 = vpack.c.bf16 %v152_v32, %v151_v31  ;;  %v136_v43 = vld [vmem:[%s1499_s1 + $0x348] sm:$0xff]  ;;  %v121_v44 = vld [vmem:[%s1499_s1 + $0x2d0] sm:$0xff]  ;;  %v931_v50 = vpack.c.bf16 %v104_v40, %v103_v39  ;;  %v1018_v25 = vmov 0.0|0.0  }
  0x31   :  { %956 = vmatpush3.bf16.msra.mxu1 %v955_v23  ;;  %v122_v45 = vld [vmem:[%s1499_s1 + $0x2d8] sm:$0xff]  ;;  %v200_v46 = vcombine.high %v1380_v35, %v1380_v35  ;;  %v199_v47 = vrot.slane %v185_v36, %v1219_v14  ;;  %v153_v48 = vld [vmem:[%s1499_s1 + $0x3d0] sm:$0xff]  ;;  %v963_v52 = vpack.c.bf16 %v136_v43, %v135_v41  ;;  %v123_v58 = vld [vmem:[%s1499_s1 + $0x2e0] sm:$0xff]  ;;  %vm1019_vm0 = vmmov 0  }
  0x32   :  { %958 = vmatprep.subr.bf16.mxu1 %v957_v28  ;;  %v154_v49 = vld [vmem:[%s1499_s1 + $0x3d8] sm:$0xff]  ;;  %v933_v53 = vpack.c.bf16 %v122_v45, %v121_v44  ;;  %v105_v14 = vld [vmem:[%s1499_s1 + $0x250] sm:$0xff]  ;;  %v124_v59 = vld [vmem:[%s1499_s1 + $0x2e8] sm:$0xff]  ;;  %v1020_v26 = vmov 0.0   ;;  %vm500_vm1 = vcmask 130048   ;;  %vm670_vm2 = vcmask 8192  }
  0x33   :  { %928 = vmatpush3.bf16.msra.mxu0 %v927_v34  ;;  %414 = vmatprep.mubr.f32.mxu0 %v200_v46  ;;  %v201_v51 = vcombine.high %v199_v47, %v199_v47  ;;  %v106_v54 = vld [vmem:[%s1499_s1 + $0x258] sm:$0xff]  ;;  %v137_v55 = vld [vmem:[%s1499_s1 + $0x350] sm:$0xff]  ;;  %v965_v56 = vpack.c.bf16 %v154_v49, %v153_v48  ;;  %v155_v60 = vld [vmem:[%s1499_s1 + $0x3e0] sm:$0xff]  ;;  %v937_v0 = vpack.c.bf16 %v124_v59, %v123_v58  ;;  %v1021_v46 = vmov 0  }
  0x34   :  { %930 = vmatprep.subr.bf16.mxu0 %v929_v38  ;;  %v138_v57 = vld [vmem:[%s1499_s1 + $0x358] sm:$0xff]  ;;  %v156_v61 = vld [vmem:[%s1499_s1 + $0x3e8] sm:$0xff]  ;;  %v935_v62 = vpack.c.bf16 %v106_v54, %v105_v14  ;;  %v107_v2 = vld [vmem:[%s1499_s1 + $0x260] sm:$0xff]  ;;  %986 = vset.pattern.permute.xlu0 %v1021_v46 }
  0x35   :  { %960 = vmatpush3.bf16.msra.mxu1 %v959_v37  ;;  %484 = vmatprep.mubr.f32.mxu1 %v201_v51  ;;  %v967_v63 = vpack.c.bf16 %v138_v57, %v137_v55  ;;  %v108_v3 = vld [vmem:[%s1499_s1 + $0x268] sm:$0xff]  ;;  %v139_v4 = vld [vmem:[%s1499_s1 + $0x360] sm:$0xff]  ;;  %v969_v5 = vpack.c.bf16 %v156_v61, %v155_v60  ;;  %v125_v7 = vld [vmem:[%s1499_s1 + $0x2f0] sm:$0xff] }
  0x36   :  { %962 = vmatprep.subr.bf16.mxu1 %v961_v42  ;;  %v140_v6 = vld [vmem:[%s1499_s1 + $0x368] sm:$0xff]  ;;  %v126_v8 = vld [vmem:[%s1499_s1 + $0x2f8] sm:$0xff]  ;;  %v157_v9 = vld [vmem:[%s1499_s1 + $0x3f0] sm:$0xff]  ;;  %v939_v11 = vpack.c.bf16 %v108_v3, %v107_v2 }
  0x37   :  { %932 = vmatpush3.bf16.msra.mxu0 %v931_v50  ;;  %v158_v10 = vld [vmem:[%s1499_s1 + $0x3f8] sm:$0xff]  ;;  %v971_v12 = vpack.c.bf16 %v140_v6, %v139_v4  ;;  %v941_v13 = vpack.c.bf16 %v126_v8, %v125_v7  ;;  %v109_v15 = vld [vmem:[%s1499_s1 + $0x270] sm:$0xff]  ;;  %v491_v22 = vld [vmem:[%s1501_s3] sm:$0xff] }
  0x38   :  { %934 = vmatprep.subr.bf16.mxu0 %v933_v53  ;;  %v110_v16 = vld [vmem:[%s1499_s1 + $0x278] sm:$0xff]  ;;  %v973_v17 = vpack.c.bf16 %v158_v10, %v157_v9  ;;  %v141_v18 = vld [vmem:[%s1499_s1 + $0x370] sm:$0xff]  ;;  %v492_v23 = vld [vmem:[%s1501_s3 + $0x8] sm:$0xff]  ;;  %v584_v53 = vsub.s32 0, %v1192_v1 }
  0x39   :  { %964 = vmatpush3.bf16.msra.mxu1 %v963_v52  ;;  %v142_v19 = vld [vmem:[%s1499_s1 + $0x378] sm:$0xff]  ;;  %v943_v20 = vpack.c.bf16 %v110_v16, %v109_v15  ;;  %v978_v24 = vpack.c.bf16 %v492_v23, %v491_v22  ;;  %v686_v28 = vld [vmem:[%s1500_s2] ss:$0 sm:$0xff] }
  0x3a   :  { %966 = vmatprep.subr.bf16.mxu1 %v965_v56  ;;  %v975_v21 = vpack.c.bf16 %v142_v19, %v141_v18  ;;  %v576_v45 = vld [vmem:[#allocation2] sm:$0x1] }
  0x3b   :  { %936 = vmatpush3.bf16.msra.mxu0 %v935_v62  ;;  %579 = vperm.xlu0 %986, %v576_v45   ;;  %v575_v52 = vld [vmem:[%s1503_s5] sm:$0x1] }
  0x3c   :  { %938 = vmatprep.subr.bf16.mxu0 %v937_v0 }
  0x3d   :  { %968 = vmatpush3.bf16.msra.mxu1 %v967_v63 }
  0x3e   :  { %970 = vmatprep.subr.bf16.mxu1 %v969_v5 }
  0x3f   :  { %940 = vmatpush3.bf16.msra.mxu0 %v939_v11 }
  0x40   :  { %942 = vmatprep.subr.bf16.mxu0 %v941_v13 }
  0x41   :  { %972 = vmatpush3.bf16.msra.mxu1 %v971_v12 }
  0x42   :  { %974 = vmatprep.subr.bf16.mxu1 %v973_v17 }
  0x43   :  { %944 = vmatpush3.bf16.msra.mxu0 %v943_v20 }
  0x44   :  { %977 = vmatprep.subr.bf16.mxu0 %v1018_v25 }
  0x45   :  { %976 = vmatpush3.bf16.msra.mxu1 %v975_v21 }
  0x46   :  { %415 = vmatmul.mubr.f32.vlgmr.msra.gmra.mrb[2].mxu0 %v1380_v35  ;;  %844 = vmatprep.subr.mxu1 %v1020_v26 }
  0x47   :  { %979 = vmatpush3.bf16.msra.mxu0 %v978_v24  ;;  %841 = vmatprep.mubr.msk.f32.mxu0 %vm1019_vm0, %v1020_v26 }
  0x48   :  { %485 = vmatmul.mubr.f32.vlgmr.msra.gmra.mrb[2].mxu1 %v199_v47  ;;  %v687_v47 = vld [vmem:[%s1502_s4] ss:$0 sm:$0xff]  ;;  %s1022_s4 = smov [#allocation3]  }
  0x49   :  { %846 = vmatprep.mubr.msk.f32.mxu1 %vm1019_vm0, %v1020_v26  ;;  %s678_s26 = sshll.u32 %s1022_s4, 4  ;;  %s679_s26 = int_to_ptr.vmem [resolvable:$true] %s678_s26 }
  0x4a   :  { %s993_s5 = scalar_lea.vmem %s679_s26, 16  ;;  %s997_s27 = scalar_lea.vmem %s679_s26, 32 }
  0x4b   :  { %p994_p0 = scmp.ne.s32.totalorder %s679_s26, %s993_s5  ;;  %p998_p1 = scmp.lt.s32.totalorder %s679_s26, %s679_s26 }
  0x4c   :  { %p999_p2 = scmp.lt.s32.totalorder %s997_s27, %s993_s5 }
  0x4e   :  { %p1000_p3 = por %p999_p2, %p998_p1 }
  0x50   :  { %p1001_p4 = pnand %p1000_p3, %p994_p0 }
  0xba   :  { %v580_v14 = vpop.permute.xlu0 %579 }
  0xbb   :  { %v585_v54 = vrot.slane %v580_v14, %v584_v53 }
  0xf9   :  { %v724_v27 = vpop.f32.mrb[0].mxu0 }
  0xfa   :  { %v725_v29 = vpop.f32.mrb[1].mxu0 }
  0xfb   :  { %v759_v30 = vpop.f32.mrb[0].mxu1  ;;  %v726_v31 = vadd.f32 %v725_v29, %v724_v27 }
  0xfc   :  { %v760_v32 = vpop.f32.mrb[1].mxu1 }
  0xfd   :  { %v761_v33 = vadd.f32 %v760_v32, %v759_v30  ;;  %v277_v34 = vadd.f32 %v726_v31, %v686_v28 }
  0xff   :  { %v347_v35 = vadd.f32 %v761_v33, %v277_v34 }
 0x119   :  { %v794_v36 = vpop.f32.mrb[2].mxu0 }
 0x11a   :  { %v795_v37 = vpop.f32.mrb[3].mxu0 }
 0x11b   :  { %v829_v38 = vpop.f32.mrb[2].mxu1  ;;  %v796_v39 = vadd.f32 %v795_v37, %v794_v36 }
 0x11c   :  { %v830_v40 = vpop.f32.mrb[3].mxu1 }
 0x11d   :  { %v831_v41 = vadd.f32 %v830_v40, %v829_v38  ;;  %v417_v42 = vadd.f32 %v796_v39, %v347_v35 }
 0x11f   :  { %v487_v43 = vadd.f32 %v831_v41, %v417_v42 }
 0x121   :  { %v490_v44 = vmax.f32 %v487_v43, 0.0 }
 0x123   :  { %842 = vmatmul.mubr.msk.f32.vlgmr.msra.gmra.mrb[4].mxu0 %vm500_vm1, %v490_v44 }
 0x1f6   :  { %v570_v48 = vpop.f32.mrb[4].mxu0 }
 0x1f7   :  { %v571_v49 = vadd.f32 %v687_v47, %v570_v48  ;;  %v843_v50 = vpop.f32.mrb[5].mxu0 }
 0x1f9   :  { %v574_v51 = vmax.f32 %v571_v49, 0.0 }
 0x1fb   :  { %845 = vmatpush3.xpose.msk.msra.mxu1 %vm500_vm1, %v574_v51 }
 0x1fe   :  { %847 = vmatmul.mubr.msk.f32.vlgmr.msra.gmra.mrb[4].mxu1 %vm500_vm1, %v575_v52 }
 0x2d1   :  { %v658_v55 = vpop.f32.mrb[4].mxu1 }
 0x2d2   :  { %v659_v56 = vadd.f32 %v658_v55, %v585_v54  ;;  %v848_v57 = vpop.f32.mrb[5].mxu1 }
 0x2d4   :  { %v691_v58 = vmul.f32 -1.442695, %v659_v56 }
 0x2d6   :  { %989 = vpow2.f32 %v691_v58 }
 0x2e0   :  { %v990_v59 = vpop.eup %989 }
 0x2e1   :  { %v665_v60 = vadd.f32 1.0, %v990_v59 }
 0x2e3   :  { %991 = vrcp.f32 %v665_v60 }
 0x2ed   :  { %v992_v61 = vpop.eup %991 }
 0x2ee   :  { %v668_v62 = vmax.f32 %v992_v61, 0.001 }
 0x2f0   :  { %v669_v63 = vmin.f32 %v668_v62, 0.999 }
 0x2f2   :  { %671 = vst.msk [vmem:[#allocation3] sm:$0x1] %vm670_vm2, %v669_v63 }
 0x2f3   :  { %1004 = shalt.err (!%p1001_p4)
}
 0x2f4   :  { %s1005_s30 = scalar_lea.hbm %s1505_s7, 16 }
 0x2f5   :  { %p1006_p5 = scmp.ne.s32.totalorder %s1505_s7, %s1005_s30  ;;  %p1009_p6 = scmp.lt.u32.totalorder %s1005_s30, %s1505_s7 }
 0x2f7   :  { %p1011_p7 = pnand %p1009_p6, %p1006_p5 }
 0x2f9   :  { %1014 = shalt.err (!%p1011_p7)
}
 0x2fa   :  { %681 = dma.vmem_to_hbm [thread:$0]  %s679_s26, 16, %s1505_s7, [#allocation4]  }
 0x2fb   :  { %1015 = dma.done.wait [#allocation4], 16  }
 0x2fc   :  { %1016 = vsyncadd [#allocation4], 4294967280 }
 0x2fd   :  { %685 = vsyncpa [#allocation4], 1 }

</bundles_post_ra>
